<compile_context>
chip_gen: v7x
topology: tpu7x:2x2x1
jax: 0.10.0
libtpu: 0.0.40
codegen_flags: <defaults>
</compile_context>

<pallas_src>
import math

import jax
import jax.numpy as jnp
from jax.experimental import pallas as pl
from jax.experimental.pallas import tpu as pltpu

TIME_WINDOW = 4
DECAY = 0.25
THRESH = 0.5

_MIB = 1024 * 1024
_MIN_SPLIT_BYTES = 2 * _MIB  # below this, splitting across TCs isn't worth the step overhead


def _mem_update_kernel(x_ref, o_ref):
    # x_ref / o_ref: (T, tm, W) VMEM tiles (or (T, 1, N) for the single-block
    # ragged path).  The time recurrence is elementwise per spatial location,
    # so every tile carries its own (mem, spike) state; T=4 is statically
    # unrolled (keep as-is: this kernel is HBM-bound, VALU has huge slack).
    mem = x_ref[0]
    spike = (mem > THRESH).astype(o_ref.dtype)
    o_ref[0] = spike
    for i in range(1, TIME_WINDOW):
        mem = mem * DECAY * (1.0 - spike) + x_ref[i]
        spike = (mem > THRESH).astype(o_ref.dtype)
        o_ref[i] = spike


def _chip_config():
    """Generation-aware block-size / VMEM / TensorCore-count knobs."""
    kind = ""
    try:
        kind = jax.devices()[0].device_kind.lower()
    except Exception:
        pass
    if "v7" in kind or "7x" in kind:
        # v7x: 3.2 TB/s HBM -> bigger blocks to amortize ~0.35us/step overhead,
        # but only 64 MiB physical VMEM -> stay <= ~40 MiB scoped. 2 TCs/chip.
        return dict(target_block_bytes=8 * _MIB, block_cap_bytes=8 * _MIB,
                    vmem_cap_bytes=40 * _MIB, num_tc=2)
    if "v5" in kind or "v6" in kind:
        # v5e/v6e: 4 MiB blocks already sit on the >=85% plateau; 128 MiB VMEM.
        return dict(target_block_bytes=4 * _MIB, block_cap_bytes=16 * _MIB,
                    vmem_cap_bytes=96 * _MIB, num_tc=1)
    # Unknown generation: conservative settings that fit every chip's VMEM.
    return dict(target_block_bytes=4 * _MIB, block_cap_bytes=8 * _MIB,
                vmem_cap_bytes=40 * _MIB, num_tc=1)


def _pick_tm(m0, row_bytes, spack, target_block_bytes, block_cap_bytes, num_tc):
    """Pick tm that exactly tiles m0 (multiple of the sublane packing, or the
    full extent).  Returns None if no legal block fits the per-block cap."""
    cands = {m0}  # full-extent block is always layout-legal
    if m0 % spack == 0:
        q = m0 // spack
        d = 1
        while d * d <= q:
            if q % d == 0:
                cands.add(spack * d)
                cands.add(spack * (q // d))
            d += 1
    cands = [t for t in cands if t * row_bytes <= block_cap_bytes]
    if not cands:
        return None

    tm_target = max(1, target_block_bytes // row_bytes)
    # Only split across TensorCores when (a) there are 2 TCs, (b) the problem
    # is big enough that halving DMA time beats the extra pipeline steps, and
    # (c) an even split actually exists.
    want_tc_split = (
        num_tc > 1
        and m0 * row_bytes >= _MIN_SPLIT_BYTES
        and any((m0 // t) >= num_tc and (m0 // t) % num_tc == 0 for t in cands)
    )

    def score(t):
        nblk = m0 // t
        tc_even = (nblk >= num_tc) and (nblk % num_tc == 0)
        return (
            tc_even if want_tc_split else True,  # even shard across both TCs (v7x)
            t <= tm_target,                      # block at/below the sweet-spot size
            t,                                   # then fewest grid steps
        )

    return max(cands, key=score)


def _vmem_limit(block_bytes, cfg):
    # 2 input + 2 output double-buffered blocks + full-tile mem/spike
    # temporaries (~block/2) + fixed headroom, capped per generation.
    need = 4 * block_bytes + block_bytes // 2 + 4 * _MIB
    return int(min(cfg["vmem_cap_bytes"], max(32 * _MIB, need)))


def _run_tiled(x3, tm, cfg):
    """x3: (T, m, W) with tm exactly dividing m (or tm == m)."""
    T, m, w = x3.shape
    block_bytes = T * tm * w * jnp.dtype(x3.dtype).itemsize
    return pl.pallas_call(
        _mem_update_kernel,
        out_shape=jax.ShapeDtypeStruct((T, m, w), x3.dtype),
        grid_spec=pltpu.PrefetchScalarGridSpec(
            num_scalar_prefetch=0,
            grid=(m // tm,),
            in_specs=[pl.BlockSpec((T, tm, w), lambda i: (0, i, 0))],
            out_specs=pl.BlockSpec((T, tm, w), lambda i: (0, i, 0)),
        ),
        # NOTE: on v7x, if profiling shows only one TensorCore issuing DMAs
        # with plain "parallel", escalate to pltpu.CORE_PARALLEL on this axis
        # (or pl.core_map over pltpu.create_tensorcore_mesh).
        compiler_params=pltpu.CompilerParams(
            dimension_semantics=("parallel",),
            vmem_limit_bytes=_vmem_limit(block_bytes, cfg),
        ),
    )(x3)


def mem_update(x):
    """x: [T, ...] float array, T == 4. Returns spikes of the same shape/dtype."""
    if x.shape[0] != TIME_WINDOW:
        raise ValueError(f"expected leading time axis {TIME_WINDOW}, got {x.shape[0]}")
    orig_shape = x.shape
    T = TIME_WINDOW
    itemsize = jnp.dtype(x.dtype).itemsize
    spack = max(8, 32 // itemsize)  # sublane packing: 8 (f32), 16 (bf16), 32 (i8/fp8)
    n = math.prod(orig_shape[1:])
    cfg = _chip_config()

    # --- preferred path: exact lane-dense (T, m0, W) tiling, NO pad / slice ---
    for w in (512, 256, 128):
        if n % w:
            continue
        m0 = n // w
        row_bytes = T * w * itemsize
        tm = _pick_tm(m0, row_bytes, spack, cfg["target_block_bytes"],
                      cfg["block_cap_bytes"], cfg["num_tc"])
        if tm is None:
            continue
        out = _run_tiled(x.reshape(T, m0, w), tm, cfg)
        return out.reshape(orig_shape)

    # --- ragged N (not a multiple of 128) ---
    whole_bytes = T * n * itemsize
    if whole_bytes <= cfg["block_cap_bytes"]:
        # Single full-extent block (T, 1, N): layout-legal for any N, no pad.
        out = _run_tiled(x.reshape(T, 1, n), 1, cfg)
        return out.reshape(orig_shape)

    # Last-resort fallback for very large ragged N: pad to a tiled slab.
    # TODO(synk): handle the ragged tail with a tiny second pallas_call instead
    # of jnp.pad/slice (each is an extra full HBM pass on this mem-bound op).
    w = 128
    rows = -(-n // w)
    row_bytes = T * w * itemsize
    tm = max(spack, (cfg["target_block_bytes"] // row_bytes) // spack * spack)
    m = -(-rows // tm) * tm
    x_flat = jnp.pad(x.reshape(T, n), ((0, 0), (0, m * w - n)))
    out = _run_tiled(x_flat.reshape(T, m, w), tm, cfg)
    return out.reshape(T, m * w)[:, :n].reshape(orig_shape)


def mem_update_ref(x):
    """Pure-JAX reference mirroring the PyTorch loop."""
    spike = jnp.zeros_like(x[0])
    outs = []
    mem_old = None
    for i in range(TIME_WINDOW):
        if i >= 1:
            mem = mem_old * DECAY * (1.0 - spike) + x[i]
        else:
            mem = x[i]
        spike = (mem > THRESH).astype(x.dtype)
        mem_old = mem
        outs.append(spike)
    return jnp.stack(outs, axis=0)


if __name__ == "__main__":
    key = jax.random.PRNGKey(0)
    k1, k2, k3 = jax.random.split(key, 3)

    # [T, B, C, H, W] = [4, 2, 4, 16, 16] -> N = 2048, exact 512-lane tiling, no pad.
    x_small = jax.random.normal(k1, (TIME_WINDOW, 2, 4, 16, 16), dtype=jnp.float32)
    out_small = jax.block_until_ready(mem_update(x_small))
    ref_small = mem_update_ref(x_small)
    assert out_small.shape == x_small.shape and out_small.dtype == x_small.dtype
    assert jnp.array_equal(out_small, ref_small), "Pallas kernel mismatch (small)"

    # N = 16384 -> exercises the divisor-based tm selection on the tiled path.
    x_big = jax.random.normal(k2, (TIME_WINDOW, 2, 8, 32, 32), dtype=jnp.float32)
    out_big = jax.block_until_ready(mem_update(x_big))
    assert jnp.array_equal(out_big, mem_update_ref(x_big)), "Pallas kernel mismatch (big)"

    # Ragged N = 2*3*5*7 = 210 (not a multiple of 128) -> single full block, no pad.
    x_rag = jax.random.normal(k3, (TIME_WINDOW, 2, 3, 5, 7), dtype=jnp.float32)
    out_rag = jax.block_until_ready(mem_update(x_rag))
    assert jnp.array_equal(out_rag, mem_update_ref(x_rag)), "Pallas kernel mismatch (ragged)"

    print("KERNEL_OK")
</pallas_src>

<mosaic_0001>
module attributes {stable_mosaic.version = 11 : i64} {
  func.func @_mem_update_kernel(%arg0: i32, %arg1: memref<4x4x512xf32, #tpu.memory_space<vmem>>, %arg2: memref<4x4x512xf32, #tpu.memory_space<vmem>>) attributes {dimension_semantics = [#tpu.dimension_semantics<parallel>], iteration_bounds = array<i64: 1>, scalar_prefetch = 0 : i64, scratch_operands = 0 : i64, tpu.core_type = #tpu.core_type<tc>, window_params = [{transform_indices = @transform_0, window_bounds = array<i64: 4, 4, 512>}, {transform_indices = @transform_1, window_bounds = array<i64: 4, 4, 512>}]} {
    %c0 = arith.constant 0 : index
    %c0_0 = arith.constant 0 : index
    %c0_1 = arith.constant 0 : index
    %0 = vector.load %arg1[%c0, %c0_0, %c0_1] : memref<4x4x512xf32, #tpu.memory_space<vmem>>, vector<1x4x512xf32>
    %1 = vector.shape_cast %0 : vector<1x4x512xf32> to vector<4x512xf32>
    %cst = arith.constant 5.000000e-01 : f32
    %2 = vector.broadcast %cst : f32 to vector<4x512xf32>
    %3 = arith.cmpf ogt, %1, %2 : vector<4x512xf32>
    %4 = arith.extui %3 : vector<4x512xi1> to vector<4x512xi32>
    %5 = arith.sitofp %4 : vector<4x512xi32> to vector<4x512xf32>
    %c0_2 = arith.constant 0 : index
    %c0_3 = arith.constant 0 : index
    %c0_4 = arith.constant 0 : index
    %6 = vector.load %arg2[%c0_2, %c0_3, %c0_4] : memref<4x4x512xf32, #tpu.memory_space<vmem>>, vector<1x4x512xf32>
    %7 = vector.shape_cast %6 : vector<1x4x512xf32> to vector<4x512xf32>
    %8 = vector.shape_cast %5 : vector<4x512xf32> to vector<1x4x512xf32>
    tpu.vector_store %arg2[%c0_2, %c0_3, %c0_4], %8 {strides = array<i32>} : memref<4x4x512xf32, #tpu.memory_space<vmem>>, vector<1x4x512xf32>,
    %cst_5 = arith.constant 2.500000e-01 : f32
    %9 = vector.broadcast %cst_5 : f32 to vector<4x512xf32>
    %10 = arith.mulf %1, %9 : vector<4x512xf32>
    %cst_6 = arith.constant 1.000000e+00 : f32
    %11 = vector.broadcast %cst_6 : f32 to vector<4x512xf32>
    %12 = arith.subf %11, %5 : vector<4x512xf32>
    %13 = arith.mulf %10, %12 : vector<4x512xf32>
    %c1 = arith.constant 1 : index
    %c0_7 = arith.constant 0 : index
    %c0_8 = arith.constant 0 : index
    %14 = vector.load %arg1[%c1, %c0_7, %c0_8] : memref<4x4x512xf32, #tpu.memory_space<vmem>>, vector<1x4x512xf32>
    %15 = vector.shape_cast %14 : vector<1x4x512xf32> to vector<4x512xf32>
    %16 = arith.addf %13, %15 : vector<4x512xf32>
    %cst_9 = arith.constant 5.000000e-01 : f32
    %17 = vector.broadcast %cst_9 : f32 to vector<4x512xf32>
    %18 = arith.cmpf ogt, %16, %17 : vector<4x512xf32>
    %19 = arith.extui %18 : vector<4x512xi1> to vector<4x512xi32>
    %20 = arith.sitofp %19 : vector<4x512xi32> to vector<4x512xf32>
    %c1_10 = arith.constant 1 : index
    %c0_11 = arith.constant 0 : index
    %c0_12 = arith.constant 0 : index
    %21 = vector.load %arg2[%c1_10, %c0_11, %c0_12] : memref<4x4x512xf32, #tpu.memory_space<vmem>>, vector<1x4x512xf32>
    %22 = vector.shape_cast %21 : vector<1x4x512xf32> to vector<4x512xf32>
    %23 = vector.shape_cast %20 : vector<4x512xf32> to vector<1x4x512xf32>
    tpu.vector_store %arg2[%c1_10, %c0_11, %c0_12], %23 {strides = array<i32>} : memref<4x4x512xf32, #tpu.memory_space<vmem>>, vector<1x4x512xf32>,
    %cst_13 = arith.constant 2.500000e-01 : f32
    %24 = vector.broadcast %cst_13 : f32 to vector<4x512xf32>
    %25 = arith.mulf %16, %24 : vector<4x512xf32>
    %cst_14 = arith.constant 1.000000e+00 : f32
    %26 = vector.broadcast %cst_14 : f32 to vector<4x512xf32>
    %27 = arith.subf %26, %20 : vector<4x512xf32>
    %28 = arith.mulf %25, %27 : vector<4x512xf32>
    %c2 = arith.constant 2 : index
    %c0_15 = arith.constant 0 : index
    %c0_16 = arith.constant 0 : index
    %29 = vector.load %arg1[%c2, %c0_15, %c0_16] : memref<4x4x512xf32, #tpu.memory_space<vmem>>, vector<1x4x512xf32>
    %30 = vector.shape_cast %29 : vector<1x4x512xf32> to vector<4x512xf32>
    %31 = arith.addf %28, %30 : vector<4x512xf32>
    %cst_17 = arith.constant 5.000000e-01 : f32
    %32 = vector.broadcast %cst_17 : f32 to vector<4x512xf32>
    %33 = arith.cmpf ogt, %31, %32 : vector<4x512xf32>
    %34 = arith.extui %33 : vector<4x512xi1> to vector<4x512xi32>
    %35 = arith.sitofp %34 : vector<4x512xi32> to vector<4x512xf32>
    %c2_18 = arith.constant 2 : index
    %c0_19 = arith.constant 0 : index
    %c0_20 = arith.constant 0 : index
    %36 = vector.load %arg2[%c2_18, %c0_19, %c0_20] : memref<4x4x512xf32, #tpu.memory_space<vmem>>, vector<1x4x512xf32>
    %37 = vector.shape_cast %36 : vector<1x4x512xf32> to vector<4x512xf32>
    %38 = vector.shape_cast %35 : vector<4x512xf32> to vector<1x4x512xf32>
    tpu.vector_store %arg2[%c2_18, %c0_19, %c0_20], %38 {strides = array<i32>} : memref<4x4x512xf32, #tpu.memory_space<vmem>>, vector<1x4x512xf32>,
    %cst_21 = arith.constant 2.500000e-01 : f32
    %39 = vector.broadcast %cst_21 : f32 to vector<4x512xf32>
    %40 = arith.mulf %31, %39 : vector<4x512xf32>
    %cst_22 = arith.constant 1.000000e+00 : f32
    %41 = vector.broadcast %cst_22 : f32 to vector<4x512xf32>
    %42 = arith.subf %41, %35 : vector<4x512xf32>
    %43 = arith.mulf %40, %42 : vector<4x512xf32>
    %c3 = arith.constant 3 : index
    %c0_23 = arith.constant 0 : index
    %c0_24 = arith.constant 0 : index
    %44 = vector.load %arg1[%c3, %c0_23, %c0_24] : memref<4x4x512xf32, #tpu.memory_space<vmem>>, vector<1x4x512xf32>
    %45 = vector.shape_cast %44 : vector<1x4x512xf32> to vector<4x512xf32>
    %46 = arith.addf %43, %45 : vector<4x512xf32>
    %cst_25 = arith.constant 5.000000e-01 : f32
    %47 = vector.broadcast %cst_25 : f32 to vector<4x512xf32>
    %48 = arith.cmpf ogt, %46, %47 : vector<4x512xf32>
    %49 = arith.extui %48 : vector<4x512xi1> to vector<4x512xi32>
    %50 = arith.sitofp %49 : vector<4x512xi32> to vector<4x512xf32>
    %c3_26 = arith.constant 3 : index
    %c0_27 = arith.constant 0 : index
    %c0_28 = arith.constant 0 : index
    %51 = vector.load %arg2[%c3_26, %c0_27, %c0_28] : memref<4x4x512xf32, #tpu.memory_space<vmem>>, vector<1x4x512xf32>
    %52 = vector.shape_cast %51 : vector<1x4x512xf32> to vector<4x512xf32>
    %53 = vector.shape_cast %50 : vector<4x512xf32> to vector<1x4x512xf32>
    tpu.vector_store %arg2[%c3_26, %c0_27, %c0_28], %53 {strides = array<i32>} : memref<4x4x512xf32, #tpu.memory_space<vmem>>, vector<1x4x512xf32>,
    return
  }
  func.func @transform_0(%arg0: i32) -> (i32, i32, i32) {
    %c0_i32 = arith.constant 0 : i32
    %c0_i32_0 = arith.constant 0 : i32
    %c0_i32_1 = arith.constant 0 : i32
    return %c0_i32, %arg0, %c0_i32_0 : i32, i32, i32
  }
  func.func @transform_1(%arg0: i32) -> (i32, i32, i32) {
    %c0_i32 = arith.constant 0 : i32
    %c0_i32_0 = arith.constant 0 : i32
    %c0_i32_1 = arith.constant 0 : i32
    return %c0_i32, %arg0, %c0_i32_0 : i32, i32, i32
  }
}

</mosaic_0001>

<bundles_post_ra>
// kernel: tpu_custom_call.1
= control target key start
LH: loop header
LB: loop body
LE: loop exit
PB: predicated region body
PF: predicated region fallthrough
CT: control target
= control target key end

     0   :  { %6 = vsyncpa [#allocation3], 0  ;;  %s216_s0 = inlined_call_operand.hbm [shape: f32[4,4,512], index: 0, kind: input, shape index: {}]   ;;  %s217_s1 = inlined_call_operand.hbm [shape: f32[4,4,512], index: 1, kind: output, shape index: {}]  }
   0x1   :  { %7 = vsyncpa [#allocation4], 0  ;;  %s171_s6 = smov [#allocation2]   ;;  %s123_s10 = scalar_lea.hbm %s216_s0, 1024 }
   0x2   :  { %s13_s7 = sshll.u32 %s171_s6, 4  ;;  %p124_p0 = scmp.ne.s32.totalorder %s216_s0, %s123_s10  ;;  %s14_s7 = int_to_ptr.vmem [resolvable:$true] %s13_s7 }
   0x3   :  { %p127_p1 = scmp.lt.u32.totalorder %s123_s10, %s216_s0 }
   0x5   :  { %p129_p2 = pnand %p127_p1, %p124_p0 }
   0x7   :  { %132 = shalt.err (!%p129_p2)
}
   0x8   :  { %s133_s15 = scalar_lea.vmem %s14_s7, 1024  ;;  %p138_p4 = scmp.lt.s32.totalorder %s14_s7, %s14_s7 }
   0x9   :  { %p134_p3 = scmp.ne.s32.totalorder %s14_s7, %s133_s15  ;;  %p139_p5 = scmp.lt.s32.totalorder %s133_s15, %s133_s15 }
   0xb   :  { %p140_p6 = por %p139_p5, %p138_p4 }
   0xd   :  { %p141_p7 = pnand %p140_p6, %p134_p3 }
   0xf   :  { %144 = shalt.err (!%p141_p7)
}
  0x10   :  { %s172_s16 = smov 256   ;;  %s173_s17 = smov 16  }
  0x11   :  { %19 = dma.hbm_to_vmem [thread:$0]  %s216_s0, 1024, %s14_s7, [#allocation3], %s172_s16, %s172_s16, %s173_s17  }
  0x12   :  { %167 = dma.done.wait [#allocation3], 1024  }
  0x13   :  { %168 = vsyncadd [#allocation3], 4294966272  ;;  %v23_v0 = vld [vmem:[#allocation2] sm:$0xff]  ;;  %v24_v1 = vld [vmem:[#allocation2 + $0x8] sm:$0xff]  ;;  %v174_v4 = vmov 0.0   ;;  %s175_s0 = smov [#allocation5]  }
  0x14   :  { %vm25_vm0 = vcmp.gt.f32.partialorder %v23_v0, 0.5  ;;  %v33_v2 = vmul.f32 0.25, %v23_v0  ;;  %vm26_vm1 = vcmp.gt.f32.partialorder %v24_v1, 0.5  ;;  %v34_v3 = vmul.f32 0.25, %v24_v1  ;;  %v40_v9 = vld [vmem:[#allocation2 + $0x10] sm:$0xff]  ;;  %v41_v10 = vld [vmem:[#allocation2 + $0x18] sm:$0xff] }
  0x15   :  { %v110_v5 = vsel %vm25_vm0, 1.0, %v174_v4  ;;  %v111_v6 = vsel %vm26_vm1, 1.0, %v174_v4  ;;  %v60_v21 = vld [vmem:[#allocation2 + $0x20] sm:$0xff]  ;;  %v61_v22 = vld [vmem:[#allocation2 + $0x28] sm:$0xff]  ;;  %v80_v33 = vld [vmem:[#allocation2 + $0x30] sm:$0xff]  ;;  %s98_s20 = sshll.u32 %s175_s0, 4  ;;  %s99_s20 = int_to_ptr.vmem [resolvable:$true] %s98_s20 }
  0x16   :  { %31 = vst [vmem:[#allocation5] sm:$0xff] %v110_v5  ;;  %v35_v7 = vsub.f32 1.0, %v110_v5  ;;  %32 = vst [vmem:[#allocation5 + $0x8] sm:$0xff] %v111_v6  ;;  %v36_v8 = vsub.f32 1.0, %v111_v6  ;;  %v81_v34 = vld [vmem:[#allocation2 + $0x38] sm:$0xff]  ;;  %s145_s21 = scalar_lea.vmem %s99_s20, 1024  ;;  %p150_p9 = scmp.lt.s32.totalorder %s99_s20, %s99_s20 }
  0x17   :  { %p146_p8 = scmp.ne.s32.totalorder %s99_s20, %s145_s21  ;;  %p151_p10 = scmp.lt.s32.totalorder %s145_s21, %s145_s21 }
  0x18   :  { %v37_v11 = vmul.f32 %v35_v7, %v33_v2  ;;  %v38_v12 = vmul.f32 %v36_v8, %v34_v3 }
  0x19   :  { %p152_p11 = por %p151_p10, %p150_p9 }
  0x1a   :  { %v42_v13 = vadd.f32 %v40_v9, %v37_v11  ;;  %v43_v14 = vadd.f32 %v41_v10, %v38_v12 }
  0x1b   :  { %p153_p12 = pnand %p152_p11, %p146_p8 }
  0x1c   :  { %vm44_vm2 = vcmp.gt.f32.partialorder %v42_v13, 0.5  ;;  %v53_v15 = vmul.f32 0.25, %v42_v13  ;;  %vm45_vm3 = vcmp.gt.f32.partialorder %v43_v14, 0.5  ;;  %v54_v16 = vmul.f32 0.25, %v43_v14 }
  0x1d   :  { %v112_v17 = vsel %vm44_vm2, 1.0, %v174_v4  ;;  %v113_v18 = vsel %vm45_vm3, 1.0, %v174_v4 }
  0x1e   :  { %51 = vst [vmem:[#allocation5 + $0x10] sm:$0xff] %v112_v17  ;;  %v55_v19 = vsub.f32 1.0, %v112_v17  ;;  %52 = vst [vmem:[#allocation5 + $0x18] sm:$0xff] %v113_v18  ;;  %v56_v20 = vsub.f32 1.0, %v113_v18 }
  0x20   :  { %v57_v23 = vmul.f32 %v55_v19, %v53_v15  ;;  %v58_v24 = vmul.f32 %v56_v20, %v54_v16 }
  0x22   :  { %v62_v25 = vadd.f32 %v60_v21, %v57_v23  ;;  %v63_v26 = vadd.f32 %v61_v22, %v58_v24 }
  0x24   :  { %vm64_vm4 = vcmp.gt.f32.partialorder %v62_v25, 0.5  ;;  %v73_v27 = vmul.f32 0.25, %v62_v25  ;;  %vm65_vm5 = vcmp.gt.f32.partialorder %v63_v26, 0.5  ;;  %v74_v28 = vmul.f32 0.25, %v63_v26 }
  0x25   :  { %v114_v29 = vsel %vm64_vm4, 1.0, %v174_v4  ;;  %v115_v30 = vsel %vm65_vm5, 1.0, %v174_v4 }
  0x26   :  { %71 = vst [vmem:[#allocation5 + $0x20] sm:$0xff] %v114_v29  ;;  %v75_v31 = vsub.f32 1.0, %v114_v29  ;;  %72 = vst [vmem:[#allocation5 + $0x28] sm:$0xff] %v115_v30  ;;  %v76_v32 = vsub.f32 1.0, %v115_v30 }
  0x28   :  { %v77_v35 = vmul.f32 %v75_v31, %v73_v27  ;;  %v78_v36 = vmul.f32 %v76_v32, %v74_v28 }
  0x2a   :  { %v82_v37 = vadd.f32 %v80_v33, %v77_v35  ;;  %v83_v38 = vadd.f32 %v81_v34, %v78_v36 }
  0x2c   :  { %vm84_vm6 = vcmp.gt.f32.partialorder %v82_v37, 0.5  ;;  %vm85_vm7 = vcmp.gt.f32.partialorder %v83_v38, 0.5 }
  0x2d   :  { %v116_v39 = vsel %vm84_vm6, 1.0, %v174_v4  ;;  %v117_v40 = vsel %vm85_vm7, 1.0, %v174_v4 }
  0x2e   :  { %91 = vst [vmem:[#allocation5 + $0x30] sm:$0xff] %v116_v39  ;;  %92 = vst [vmem:[#allocation5 + $0x38] sm:$0xff] %v117_v40 }
  0x2f   :  { %156 = shalt.err (!%p153_p12)
}
  0x30   :  { %s157_s24 = scalar_lea.hbm %s217_s1, 1024 }
  0x31   :  { %p158_p13 = scmp.ne.s32.totalorder %s217_s1, %s157_s24  ;;  %p161_p0 = scmp.lt.u32.totalorder %s157_s24, %s217_s1 }
  0x33   :  { %p163_p1 = pnand %p161_p0, %p158_p13 }
  0x35   :  { %166 = shalt.err (!%p163_p1)
}
  0x36   :  { %104 = dma.vmem_to_hbm [thread:$0]  %s99_s20, 1024, %s217_s1, [#allocation4], %s172_s16, %s172_s16, %s173_s17  }
  0x37   :  { %169 = dma.done.wait [#allocation4], 1024  }
  0x38   :  { %170 = vsyncadd [#allocation4], 4294966272 }
  0x39   :  { %108 = vsyncpa [#allocation3], 1 }
  0x3a   :  { %109 = vsyncpa [#allocation4], 1 }

</bundles_post_ra>
